<compile_context>
chip_gen: v7x
topology: tpu7x:2x2x1
jax: 0.10.0
libtpu: 0.0.40
codegen_flags: <defaults>
</compile_context>

<pallas_src>
import jax
import jax.numpy as jnp
from jax import lax
from jax.experimental import pallas as pl
from jax.experimental.pallas import tpu as pltpu


# ----------------------------------------------------------------------------- #
# VMEM budget helper (per-generation headroom).
# ----------------------------------------------------------------------------- #
def _vmem_limit_bytes():
    try:
        cap = int(pltpu.get_tpu_info().vmem_capacity_bytes)
    except Exception:
        cap = 64 * 1024 * 1024
    # leave ~1/8 headroom, never ask for more than 100 MiB
    return int(min(cap - cap // 8, 100 * 1024 * 1024))


# ----------------------------------------------------------------------------- #
# Fused  (x @ w) -> BatchNorm1d(train stats over rows) -> activation
#        [optionally -> relu(y) * spec  (the UMX mask) fused in the epilogue]
# Tiled over the output-feature (N) axis; bf16 x stays resident across the grid.
# ----------------------------------------------------------------------------- #
def _make_fc_bn_act_kernel(act):
    with_mask = act == "mask"

    def kernel(*refs):
        if with_mask:
            x_ref, w_ref, gamma_ref, beta_ref, spec_ref, o_ref = refs
        else:
            x_ref, w_ref, gamma_ref, beta_ref, o_ref = refs
        # bf16 MXU operands, f32 accumulation.
        y = jnp.dot(x_ref[...], w_ref[...], preferred_element_type=jnp.float32)
        # one-pass BN stats (train mode, biased variance)
        mean = jnp.mean(y, axis=0, keepdims=True)
        var = jnp.maximum(jnp.mean(y * y, axis=0, keepdims=True) - mean * mean, 0.0)
        y = (y - mean) * lax.rsqrt(var + 1e-5)
        y = y * gamma_ref[...] + beta_ref[...]
        if act == "tanh":
            y = jnp.tanh(y)
        elif act == "relu":
            y = jnp.maximum(y, 0.0)
        elif act == "mask":
            y = jnp.maximum(y, 0.0) * spec_ref[...]
        o_ref[...] = y.astype(o_ref.dtype)

    return kernel


def _pick_feature_tile(N):
    """Feature tile: multiple of 128, preferring >= 4 grid steps (overlap + megacore)."""
    # TODO(synk): on v7x (64 MiB VMEM/TC) cap fc3 tiles at 256 at production widths.
    for t in (512, 256, 128):
        if N % t == 0 and N // t >= 4:
            return t
    for t in (256, 128):
        if N % t == 0 and N // t >= 2:
            return t
    return N


def pl_fc_bn_act(x, w, gamma, beta, act, spec=None, out_dtype=jnp.bfloat16):
    # TODO(synk): at full UMX sizes (frames*B in the thousands, K = C*nfft ~ 8K) the
    # resident-x design needs a row-chunked two-pass BN on v7x (64 MiB/TC); bf16 x
    # plus the explicit vmem_limit keeps it within budget at these sizes.
    R, K = x.shape
    N = w.shape[1]
    tn = _pick_feature_tile(N)
    in_specs = [
        pl.BlockSpec((R, K), lambda j: (0, 0)),      # bf16 x resident across the N grid
        pl.BlockSpec((K, tn), lambda j: (0, j)),
        pl.BlockSpec((1, tn), lambda j: (0, j)),
        pl.BlockSpec((1, tn), lambda j: (0, j)),
    ]
    args = [x, w, gamma, beta]
    if spec is not None:
        in_specs.append(pl.BlockSpec((R, tn), lambda j: (0, j)))
        args.append(spec)
    return pl.pallas_call(
        _make_fc_bn_act_kernel(act),
        out_shape=jax.ShapeDtypeStruct((R, N), out_dtype),
        grid=(N // tn,),
        in_specs=in_specs,
        out_specs=pl.BlockSpec((R, tn), lambda j: (0, j)),
        compiler_params=pltpu.CompilerParams(
            dimension_semantics=("parallel",),
            vmem_limit_bytes=_vmem_limit_bytes()),
    )(*args)


# ----------------------------------------------------------------------------- #
# Plain linear (x @ w + b), row-tiled (no padding copy; Pallas masks the edge
# block).  Used for the LSTM input projections, both directions fused along the
# output axis.  bf16 in / bf16 out, f32 accumulate + bias.
# ----------------------------------------------------------------------------- #
def _linear_bias_kernel(x_ref, w_ref, b_ref, o_ref):
    y = jnp.dot(x_ref[...], w_ref[...], preferred_element_type=jnp.float32)
    o_ref[...] = (y + b_ref[...]).astype(o_ref.dtype)


def pl_linear(x, w, b, out_dtype=jnp.bfloat16):
    R, K = x.shape
    N = w.shape[1]
    rt = min(512, 8 * pl.cdiv(R, 8))          # large row tiles; >= 8 sublanes
    return pl.pallas_call(
        _linear_bias_kernel,
        out_shape=jax.ShapeDtypeStruct((R, N), out_dtype),
        grid=(pl.cdiv(R, rt),),
        in_specs=[
            pl.BlockSpec((rt, K), lambda i: (i, 0)),
            pl.BlockSpec((K, N), lambda i: (0, 0)),
            pl.BlockSpec((1, N), lambda i: (0, 0)),
        ],
        out_specs=pl.BlockSpec((rt, N), lambda i: (i, 0)),
        compiler_params=pltpu.CompilerParams(
            dimension_semantics=("parallel",),
            vmem_limit_bytes=_vmem_limit_bytes()),
    )(x, w, b.reshape(1, N))


# ----------------------------------------------------------------------------- #
# Bidirectional LSTM recurrence, both directions fused per timestep.
#   xp_ref : (T, Bc, 8*Hd) bf16 -- input-gate pre-activations, lane layout
#            [fwd i,f,o,g | bwd i,f,o,g], natural time order for BOTH directions.
#   whh_ref: (2, Hd, 4*Hd) bf16 -- recurrent weights per direction.
#   outf/outb: (T, Bc, Hd) bf16 -- backward outputs written at the reversed time
#            index so the wrapper needs no flip, only a lane concat.
# One batched recurrent matmul per step (einsum over the size-2 direction axis),
# one sigmoid over the contiguous (i, f, o) slab, one tanh over g.
# ----------------------------------------------------------------------------- #
def _lstm_bidir_kernel(xp_ref, whh_ref, outf_ref, outb_ref, h_scr, c_scr):
    T = xp_ref.shape[0]
    Hd = outf_ref.shape[-1]
    G = 4 * Hd
    h_scr[...] = jnp.zeros_like(h_scr)
    c_scr[...] = jnp.zeros_like(c_scr)

    def body(t, carry):
        tb = T - 1 - t
        h = h_scr[...]                                             # (2, Bc, Hd) f32
        # TODO(synk): Bc (=audio channels) is below the 8-sublane minimum; W_hh could
        # also be pinned via matmul_push_rhs across steps for the latency-bound path.
        zr = jnp.einsum("dbh,dhg->dbg", h.astype(jnp.bfloat16), whh_ref[...],
                        preferred_element_type=jnp.float32)        # (2, Bc, 4*Hd)
        x_f = xp_ref[t][:, :G].astype(jnp.float32)                 # forward @ time t
        x_b = xp_ref[tb][:, G:].astype(jnp.float32)                # backward @ time T-1-t
        z = zr + jnp.stack([x_f, x_b], axis=0)
        sig = jax.nn.sigmoid(z[..., : 3 * Hd])                     # gates i, f, o
        gi = sig[..., :Hd]
        gf = sig[..., Hd:2 * Hd]
        go = sig[..., 2 * Hd:]
        gg = jnp.tanh(z[..., 3 * Hd:])                             # gate g
        c = gf * c_scr[...] + gi * gg
        hn = go * jnp.tanh(c)
        c_scr[...] = c
        h_scr[...] = hn
        hb = hn.astype(outf_ref.dtype)
        outf_ref[t] = hb[0]
        outb_ref[tb] = hb[1]
        return carry

    lax.fori_loop(0, T, body, 0, unroll=2)


def pl_lstm_bidir(xp, whh):
    # xp: (T, Bc, 8*Hd) bf16 ; whh: (2, Hd, 4*Hd) bf16
    T, Bc, G8 = xp.shape
    Hd = G8 // 8
    out_f, out_b = pl.pallas_call(
        _lstm_bidir_kernel,
        out_shape=(jax.ShapeDtypeStruct((T, Bc, Hd), jnp.bfloat16),
                   jax.ShapeDtypeStruct((T, Bc, Hd), jnp.bfloat16)),
        in_specs=[pl.BlockSpec(memory_space=pltpu.MemorySpace.VMEM),
                  pl.BlockSpec(memory_space=pltpu.MemorySpace.VMEM)],
        out_specs=(pl.BlockSpec(memory_space=pltpu.MemorySpace.VMEM),
                   pl.BlockSpec(memory_space=pltpu.MemorySpace.VMEM)),
        scratch_shapes=[pltpu.VMEM((2, Bc, Hd), jnp.float32),
                        pltpu.VMEM((2, Bc, Hd), jnp.float32)],
        compiler_params=pltpu.CompilerParams(
            vmem_limit_bytes=_vmem_limit_bytes()),
    )(xp, whh)
    # TODO(synk): at very large T (production frames) chunk T with an in-kernel
    # double-buffered DMA instead of keeping the full xp resident in VMEM.
    return jnp.concatenate([out_f, out_b], axis=-1)   # (T, Bc, 2*Hd) bf16


# ----------------------------------------------------------------------------- #
# Plain-JAX glue: STFT matching torch.stft(center=True, reflect pad, periodic
# Hann, normalized=True).
# ----------------------------------------------------------------------------- #
def jax_stft(x, nfft, hop):
    # x: (N, T) real
    pad = nfft // 2
    xp = jnp.pad(x, ((0, 0), (pad, pad)), mode="reflect")
    n_frames = 1 + x.shape[-1] // hop
    idx = hop * jnp.arange(n_frames)[:, None] + jnp.arange(nfft)[None, :]
    frames = xp[:, idx]                                   # (N, frames, nfft)
    n = jnp.arange(nfft, dtype=jnp.float32)
    win = 0.5 * (1.0 - jnp.cos(2.0 * jnp.pi * n / nfft))  # periodic Hann (torch default)
    z = jnp.fft.rfft(frames * win, axis=-1) / jnp.sqrt(jnp.float32(nfft))
    return jnp.transpose(z, (0, 2, 1))                    # (N, freqs, frames)


# ----------------------------------------------------------------------------- #
# Parameters (deterministic synthetic init).  Matmul weights bf16, BN scale/shift
# and biases f32.  LSTM gate order is (i, f, o, g); directions fused along the
# output axis of W_ih / bias.
# ----------------------------------------------------------------------------- #
def init_params(key, nfft, audio_ch, hidden, layers):
    Hd = hidden // 2
    ks = jax.random.split(key, 10)

    def rnd(k, shape, scale=0.1):
        return scale * jax.random.normal(k, shape, dtype=jnp.float32)

    p = {
        "w1": rnd(ks[0], (audio_ch * nfft, hidden)).astype(jnp.bfloat16),   # fc1 (no bias)
        "g1": 1.0 + rnd(ks[1], (1, hidden), 0.05),
        "b1": rnd(ks[2], (1, hidden), 0.05),
        "w2": rnd(ks[3], (2 * hidden, hidden)).astype(jnp.bfloat16),        # fc2 (no bias)
        "g2": 1.0 + rnd(ks[4], (1, hidden), 0.05),
        "b2": rnd(ks[5], (1, hidden), 0.05),
        "w3": rnd(ks[6], (hidden, audio_ch * nfft)).astype(jnp.bfloat16),   # fc3 (no bias)
        "g3": 1.0 + rnd(ks[7], (1, audio_ch * nfft), 0.05),
        "b3": rnd(ks[8], (1, audio_ch * nfft), 0.05),
    }

    lstm = []
    kl = jax.random.split(ks[9], layers * 3)
    for layer in range(layers):
        in_sz = hidden                       # 2*Hd == hidden for every layer
        k_w, k_b, k_h = kl[3 * layer], kl[3 * layer + 1], kl[3 * layer + 2]
        lstm.append({
            # both directions fused along the output axis; gate order (i, f, o, g)
            "wih": rnd(k_w, (in_sz, 2 * 4 * Hd)).astype(jnp.bfloat16),      # W_ih^T
            "bias": rnd(k_b, (1, 2 * 4 * Hd), 0.05),                        # b_ih + b_hh
            "whh": rnd(k_h, (2, Hd, 4 * Hd)).astype(jnp.bfloat16),          # W_hh^T per dir
        })
    p["lstm"] = lstm
    return p


# ----------------------------------------------------------------------------- #
# UMX forward
# ----------------------------------------------------------------------------- #
def umx_forward(mix, params, nfft, hidden, layers, n_sources):
    B, C, Tlen = mix.shape
    hop = nfft // 4
    Hd = hidden // 2

    # --- STFT -> magnitude spectrogram (glue) ---
    z = jax_stft(mix.reshape(-1, Tlen), nfft, hop)              # (B*C, nfft//2+1, frames)
    z = z.reshape(B, C, nfft // 2 + 1, -1)[:, :, :-1, :]        # drop last freq bin
    mag = jnp.abs(z).astype(jnp.float32)                        # (B, C, bins, frames)

    x = jnp.transpose(mag, (3, 0, 1, 2))                        # (frames, B, C, bins)
    frames, _, _, bins = x.shape
    x_spec = x
    x = x[..., : min(nfft, bins)]                               # crop (no-op: bins < nfft)

    # --- fc1 + bn1 + tanh (fused, feature-tiled), bf16 activations ---
    x = x.reshape(-1, C * nfft).astype(jnp.bfloat16)            # faithful to reference reshape
    x = pl_fc_bn_act(x, params["w1"], params["g1"], params["b1"],
                     act="tanh", out_dtype=jnp.bfloat16)
    x = x.reshape(frames, C, hidden)                            # requires B == 2 * C (as in ref)

    # --- 3-layer bidirectional LSTM ---
    h = x
    for layer in range(layers):
        pd = params["lstm"][layer]
        xp = pl_linear(h.reshape(frames * C, h.shape[-1]), pd["wih"], pd["bias"],
                       out_dtype=jnp.bfloat16)                  # (T*Bc, 8*Hd) gate pre-acts
        xp = xp.reshape(frames, C, 8 * Hd)                      # [fwd gates | bwd gates]
        h = pl_lstm_bidir(xp, pd["whh"])                        # (T, Bc, 2*Hd) bf16
        # TODO(synk): inter-layer LSTM dropout (p=0.4, train-mode only) is stochastic; omitted.

    x = jnp.concatenate([x, h], axis=-1)                        # (frames, C, 2*hidden) bf16

    # --- fc2 + bn2 + relu ---
    x = pl_fc_bn_act(x.reshape(-1, 2 * hidden),
                     params["w2"], params["g2"], params["b2"],
                     act="relu", out_dtype=jnp.bfloat16)

    # --- fc3 + bn3 with relu(net) * spectrogram mask fused in the epilogue ---
    spec2d = x_spec.reshape(-1, C * nfft)                       # same flat layout as fc3 output
    x = pl_fc_bn_act(x, params["w3"], params["g3"], params["b3"],
                     act="mask", spec=spec2d, out_dtype=jnp.float32)

    x = x.reshape(frames, B, C, bins)
    x = jnp.transpose(x, (1, 2, 3, 0))                          # (B, C, bins, frames)
    x = x.reshape(B, n_sources, C, bins, frames)                # needs n_sources == 1 (as in ref)
    # TODO(synk): reference `_mask` (Wiener filtering) and `self.istft` are undefined /
    # broken in the source module (undefined B, T, wiener, missing istft attribute);
    # returning the per-source masked magnitude spectrogram instead.
    return x


# ----------------------------------------------------------------------------- #
if __name__ == "__main__":
    NFFT = 16
    HIDDEN = 32
    LAYERS = 3
    SOURCES = ["vocals"]           # reference view() is only valid for 1 source
    AUDIO_CH = 2
    NSAMP = 4                      # reference reshape requires nb_samples == 2 * audio_channels
    TLEN = 28                      # -> 8 STFT frames with hop = NFFT // 4

    key = jax.random.PRNGKey(0)
    k_mix, k_par = jax.random.split(key)
    mix = jax.random.normal(k_mix, (NSAMP, AUDIO_CH, TLEN), dtype=jnp.float32)
    params = init_params(k_par, NFFT, AUDIO_CH, HIDDEN, LAYERS)

    out = umx_forward(mix, params, NFFT, HIDDEN, LAYERS, len(SOURCES))
    out = jax.block_until_ready(out)
    assert out.shape == (NSAMP, len(SOURCES), AUDIO_CH, NFFT // 2, 1 + TLEN // (NFFT // 4))
    assert bool(jnp.all(jnp.isfinite(out)))
    print("KERNEL_OK")
</pallas_src>

<mosaic_0001>
module attributes {stable_mosaic.version = 11 : i64} {
  func.func @kernel(%arg0: i32, %arg1: memref<16x32xbf16, #tpu.memory_space<vmem>>, %arg2: memref<32x32xbf16, #tpu.memory_space<vmem>>, %arg3: memref<1x32xf32, #tpu.memory_space<vmem>>, %arg4: memref<1x32xf32, #tpu.memory_space<vmem>>, %arg5: memref<16x32xbf16, #tpu.memory_space<vmem>>) attributes {dimension_semantics = [#tpu.dimension_semantics<parallel>], iteration_bounds = array<i64: 1>, scalar_prefetch = 0 : i64, scratch_operands = 0 : i64, tpu.core_type = #tpu.core_type<tc>, window_params = [{pipeline_mode = #tpu.pipeline_mode<synchronous>, transform_indices = @transform_0, window_bounds = array<i64: 16, 32>}, {transform_indices = @transform_1, window_bounds = array<i64: 32, 32>}, {transform_indices = @transform_2, window_bounds = array<i64: 1, 32>}, {transform_indices = @transform_3, window_bounds = array<i64: 1, 32>}, {transform_indices = @transform_4, window_bounds = array<i64: 16, 32>}]} {
    %c0 = arith.constant 0 : index
    %c0_0 = arith.constant 0 : index
    %0 = vector.load %arg1[%c0, %c0_0] : memref<16x32xbf16, #tpu.memory_space<vmem>>, vector<16x32xbf16>
    %c0_1 = arith.constant 0 : index
    %c0_2 = arith.constant 0 : index
    %1 = vector.load %arg2[%c0_1, %c0_2] : memref<32x32xbf16, #tpu.memory_space<vmem>>, vector<32x32xbf16>
    %cst = arith.constant dense<0.000000e+00> : vector<16x32xf32>
    %2 = tpu.matmul %0, %1, %cst {dimension_numbers = #tpu.dot_dimension_numbers<[1], [0], [0], [1], [0, 0, 1, 1], [], []>} : vector<16x32xbf16>, vector<32x32xbf16>, vector<16x32xf32> -> vector<16x32xf32>
    %cst_3 = arith.constant dense<0.000000e+00> : vector<32xf32>
    %3 = vector.multi_reduction <add>, %2, %cst_3 [0] : vector<16x32xf32> to vector<32xf32>
    %4 = vector.shape_cast %3 : vector<32xf32> to vector<1x32xf32>
    %cst_4 = arith.constant 1.600000e+01 : f32
    %5 = vector.broadcast %cst_4 : f32 to vector<1x32xf32>
    %6 = arith.divf %4, %5 : vector<1x32xf32>
    %7 = arith.mulf %2, %2 : vector<16x32xf32>
    %cst_5 = arith.constant dense<0.000000e+00> : vector<32xf32>
    %8 = vector.multi_reduction <add>, %7, %cst_5 [0] : vector<16x32xf32> to vector<32xf32>
    %9 = vector.shape_cast %8 : vector<32xf32> to vector<1x32xf32>
    %cst_6 = arith.constant 1.600000e+01 : f32
    %10 = vector.broadcast %cst_6 : f32 to vector<1x32xf32>
    %11 = arith.divf %9, %10 : vector<1x32xf32>
    %12 = arith.mulf %6, %6 : vector<1x32xf32>
    %13 = arith.subf %11, %12 : vector<1x32xf32>
    %cst_7 = arith.constant 0.000000e+00 : f32
    %14 = vector.broadcast %cst_7 : f32 to vector<1x32xf32>
    %15 = arith.maximumf %13, %14 : vector<1x32xf32>
    %16 = vector.broadcast %6 : vector<1x32xf32> to vector<16x32xf32>
    %17 = arith.subf %2, %16 : vector<16x32xf32>
    %cst_8 = arith.constant 9.99999974E-6 : f32
    %18 = vector.broadcast %cst_8 : f32 to vector<1x32xf32>
    %19 = arith.addf %15, %18 : vector<1x32xf32>
    %20 = math.rsqrt %19 : vector<1x32xf32>
    %21 = vector.broadcast %20 : vector<1x32xf32> to vector<16x32xf32>
    %22 = arith.mulf %17, %21 : vector<16x32xf32>
    %c0_9 = arith.constant 0 : index
    %c0_10 = arith.constant 0 : index
    %23 = vector.load %arg3[%c0_9, %c0_10] : memref<1x32xf32, #tpu.memory_space<vmem>>, vector<1x32xf32>
    %24 = vector.broadcast %23 : vector<1x32xf32> to vector<16x32xf32>
    %25 = arith.mulf %22, %24 : vector<16x32xf32>
    %c0_11 = arith.constant 0 : index
    %c0_12 = arith.constant 0 : index
    %26 = vector.load %arg4[%c0_11, %c0_12] : memref<1x32xf32, #tpu.memory_space<vmem>>, vector<1x32xf32>
    %27 = vector.broadcast %26 : vector<1x32xf32> to vector<16x32xf32>
    %28 = arith.addf %25, %27 : vector<16x32xf32>
    %29 = math.tanh %28 : vector<16x32xf32>
    %30 = arith.truncf %29 : vector<16x32xf32> to vector<16x32xbf16>
    %c0_13 = arith.constant 0 : index
    %c0_14 = arith.constant 0 : index
    %31 = vector.load %arg5[%c0_13, %c0_14] : memref<16x32xbf16, #tpu.memory_space<vmem>>, vector<16x32xbf16>
    tpu.vector_store %arg5[%c0_13, %c0_14], %30 {strides = array<i32>} : memref<16x32xbf16, #tpu.memory_space<vmem>>, vector<16x32xbf16>,
    return
  }
  func.func @transform_0(%arg0: i32) -> (i32, i32) {
    %c0_i32 = arith.constant 0 : i32
    %c0_i32_0 = arith.constant 0 : i32
    %c0_i32_1 = arith.constant 0 : i32
    return %c0_i32, %c0_i32_0 : i32, i32
  }
  func.func @transform_1(%arg0: i32) -> (i32, i32) {
    %c0_i32 = arith.constant 0 : i32
    %c0_i32_0 = arith.constant 0 : i32
    return %c0_i32, %arg0 : i32, i32
  }
  func.func @transform_2(%arg0: i32) -> (i32, i32) {
    %c0_i32 = arith.constant 0 : i32
    %c0_i32_0 = arith.constant 0 : i32
    return %c0_i32, %arg0 : i32, i32
  }
  func.func @transform_3(%arg0: i32) -> (i32, i32) {
    %c0_i32 = arith.constant 0 : i32
    %c0_i32_0 = arith.constant 0 : i32
    return %c0_i32, %arg0 : i32, i32
  }
  func.func @transform_4(%arg0: i32) -> (i32, i32) {
    %c0_i32 = arith.constant 0 : i32
    %c0_i32_0 = arith.constant 0 : i32
    return %c0_i32, %arg0 : i32, i32
  }
}

</mosaic_0001>

<bundles_post_ra>
// kernel: tpu_custom_call.1
= control target key start
LH: loop header
LB: loop body
LE: loop exit
PB: predicated region body
PF: predicated region fallthrough
CT: control target
= control target key end

     0   :  { %9 = vsyncpa [#allocation3], 0  ;;  %s388_s0 = inlined_call_operand.hbm [shape: bf16[16,32], index: 0, kind: input, shape index: {}]   ;;  %s389_s1 = inlined_call_operand.hbm [shape: bf16[32,32], index: 1, kind: input, shape index: {}]   ;;  %s390_s2 = inlined_call_operand.vmem [shape: f32[1,32], index: 2, kind: input, shape index: {}]   ;;  %s391_s3 = inlined_call_operand.vmem [shape: f32[1,32], index: 3, kind: input, shape index: {}]   ;;  %s392_s4 = inlined_call_operand.hbm [shape: bf16[16,32], index: 4, kind: output, shape index: {}]  }
   0x1   :  { %10 = vsyncpa [#allocation6], 0 }
   0x2   :  { %11 = vsyncpa [#allocation4], 0  ;;  %s305_s15 = smov [#allocation2]   ;;  %s233_s19 = scalar_lea.hbm %s388_s0, 128 }
   0x3   :  { %s17_s16 = sshll.u32 %s305_s15, 4  ;;  %p234_p0 = scmp.ne.s32.totalorder %s388_s0, %s233_s19  ;;  %s18_s16 = int_to_ptr.vmem [resolvable:$true] %s17_s16 }
   0x4   :  { %p237_p1 = scmp.lt.u32.totalorder %s233_s19, %s388_s0 }
   0x6   :  { %p239_p2 = pnand %p237_p1, %p234_p0 }
   0x8   :  { %242 = shalt.err (!%p239_p2)
}
   0x9   :  { %s243_s24 = scalar_lea.vmem %s18_s16, 128  ;;  %p248_p4 = scmp.lt.s32.totalorder %s18_s16, %s18_s16 }
   0xa   :  { %p244_p3 = scmp.ne.s32.totalorder %s18_s16, %s243_s24  ;;  %p249_p5 = scmp.lt.s32.totalorder %s243_s24, %s243_s24 }
   0xc   :  { %p250_p6 = por %p249_p5, %p248_p4 }
   0xe   :  { %p251_p7 = pnand %p250_p6, %p244_p3 }
  0x10   :  { %254 = shalt.err (!%p251_p7)
}
  0x11   :  { %s306_s25 = smov 64   ;;  %s307_s26 = smov 4  }
  0x12   :  { %23 = dma.hbm_to_vmem [thread:$0]  %s388_s0, 128, %s18_s16, [#allocation3], %s306_s25, %s306_s25, %s307_s26  }
  0x13   :  { %s308_s29 = smov [#allocation5]   ;;  %s255_s7 = scalar_lea.hbm %s389_s1, 256 }
  0x14   :  { %s29_s30 = sshll.u32 %s308_s29, 4  ;;  %p256_p8 = scmp.ne.s32.totalorder %s389_s1, %s255_s7  ;;  %s30_s30 = int_to_ptr.vmem [resolvable:$true] %s29_s30 }
  0x15   :  { %p259_p9 = scmp.lt.u32.totalorder %s255_s7, %s389_s1 }
  0x17   :  { %p261_p10 = pnand %p259_p9, %p256_p8 }
  0x19   :  { %264 = shalt.err (!%p261_p10)
}
  0x1a   :  { %s265_s12 = scalar_lea.vmem %s30_s30, 256  ;;  %p270_p12 = scmp.lt.s32.totalorder %s30_s30, %s30_s30 }
  0x1b   :  { %p266_p11 = scmp.ne.s32.totalorder %s30_s30, %s265_s12  ;;  %p271_p13 = scmp.lt.s32.totalorder %s265_s12, %s265_s12 }
  0x1d   :  { %p272_p0 = por %p271_p13, %p270_p12 }
  0x1f   :  { %p273_p1 = pnand %p272_p0, %p266_p11 }
  0x21   :  { %276 = shalt.err (!%p273_p1)
}
  0x22   :  { %35 = dma.hbm_to_vmem [thread:$0]  %s389_s1, 256, %s30_s30, [#allocation6], %s306_s25, %s306_s25, %s307_s26  }
  0x23   :  { %299 = dma.done.wait [#allocation3], 128  }
  0x24   :  { %300 = vsyncadd [#allocation3], 4294967168 }
  0x25   :  { %301 = dma.done.wait [#allocation6], 256  }
  0x26   :  { %302 = vsyncadd [#allocation6], 4294967040  ;;  %v309_v0 = vmov 0.0   ;;  %vm310_vm0 = vmmov 0   ;;  %v224_v1 = vld [vmem:[#allocation5] sm:$0xff]   ;;  %v225_v2 = vld [vmem:[#allocation5 + $0x8] sm:$0xff]  }
  0x27   :  { %209 = vmatprep.subr.bf16.mxu0 %v309_v0  ;;  %213 = vmatprep.mubr.msk.bf16.mxu0 %vm310_vm0, %v309_v0  ;;  %v226_v3 = vld [vmem:[#allocation2] sm:$0xff]   ;;  %vm70_vm1 = vcmask 261120   ;;  %s311_s17 = smov [#allocation7]   ;;  %vm175_vm2 = vcmask 257024  }
  0x28   :  { %210 = vmatpush3.bf16.msra.mxu0 %v224_v1  ;;  %v200_v37 = vld [vmem:[%s390_s2] ss:$0 sm:$0xff]  ;;  %s183_s18 = sshll.u32 %s311_s17, 4  ;;  %s184_s18 = int_to_ptr.vmem [resolvable:$true] %s183_s18 }
  0x29   :  { %211 = vmatprep.subr.bf16.mxu0 %v309_v0  ;;  %v201_v40 = vld [vmem:[%s391_s3] ss:$0 sm:$0xff]  ;;  %s277_s2 = scalar_lea.vmem %s184_s18, 128  ;;  %p282_p3 = scmp.lt.s32.totalorder %s184_s18, %s184_s18 }
  0x2a   :  { %p278_p2 = scmp.ne.s32.totalorder %s184_s18, %s277_s2  ;;  %p283_p4 = scmp.lt.s32.totalorder %s277_s2, %s277_s2 }
  0x2c   :  { %212 = vmatpush3.bf16.msra.mxu0 %v225_v2  ;;  %p284_p5 = por %p283_p4, %p282_p3 }
  0x2e   :  { %p285_p6 = pnand %p284_p5, %p278_p2 }
  0x2f   :  { %214 = vmatmul.mubr.msk.bf16.vlgmr.msra.gmra.mrb[0].mxu0 %vm70_vm1, %v226_v3 }
 0x102   :  { %v108_v4 = vpop.f32.mrb[0].mxu0 }
 0x103   :  { %v126_v5 = vmul.f32 %v108_v4, %v108_v4  ;;  %v215_v6 = vpop.f32.mrb[1].mxu0  ;;  %v115_v8 = vsel %vm70_vm1, %v108_v4, 0.0 }
 0x104   :  { %v111_v7 = vpop.f32.mrb[2].mxu0 }
 0x105   :  { %v116_v9 = vsel %vm70_vm1, %v111_v7, 0.0  ;;  %v127_v10 = vmul.f32 %v111_v7, %v111_v7  ;;  %v216_v11 = vpop.f32.mrb[3].mxu0  ;;  %v128_v13 = vsel %vm70_vm1, %v126_v5, 0.0 }
 0x106   :  { %v117_v12 = vadd.f32 %v116_v9, %v115_v8 }
 0x107   :  { %v129_v14 = vsel %vm70_vm1, %v127_v10, 0.0 }
 0x108   :  { %v118_v15 = vrot.slane %v117_v12, 4  ;;  %v130_v16 = vadd.f32 %v129_v14, %v128_v13 }
 0x10a   :  { %v119_v17 = vadd.f32 %v118_v15, %v117_v12  ;;  %v131_v18 = vrot.slane %v130_v16, 4 }
 0x10c   :  { %v120_v19 = vrot.slane %v119_v17, 2  ;;  %v132_v20 = vadd.f32 %v131_v18, %v130_v16 }
 0x10e   :  { %v121_v21 = vadd.f32 %v120_v19, %v119_v17  ;;  %v133_v22 = vrot.slane %v132_v20, 2 }
 0x110   :  { %v122_v23 = vrot.slane %v121_v21, 1  ;;  %v134_v24 = vadd.f32 %v133_v22, %v132_v20 }
 0x112   :  { %v123_v25 = vadd.f32 %v122_v23, %v121_v21  ;;  %v135_v26 = vrot.slane %v134_v24, 1 }
 0x114   :  { %v125_v27 = vmul.f32 0.0625, %v123_v25  ;;  %v136_v28 = vadd.f32 %v135_v26, %v134_v24 }
 0x116   :  { %v137_v29 = vmul.f32 0.0625, %v136_v28  ;;  %v138_v30 = vmul.f32 %v125_v27, %v125_v27  ;;  %v141_v31 = vsub.f32 %v108_v4, %v125_v27  ;;  %v142_v32 = vsub.f32 %v111_v7, %v125_v27 }
 0x118   :  { %v139_v33 = vsub.f32 %v137_v29, %v138_v30 }
 0x11a   :  { %v140_v34 = vmax.f32 %v139_v33, 0.0 }
 0x11c   :  { %v143_v35 = vadd.f32 1e-05, %v140_v34 }
 0x11e   :  { %227 = vrsqrt.f32 %v143_v35 }
 0x128   :  { %v228_v36 = vpop.eup %227 }
 0x129   :  { %v145_v38 = vmul.f32 %v228_v36, %v141_v31  ;;  %v146_v39 = vmul.f32 %v228_v36, %v142_v32 }
 0x12b   :  { %v154_v41 = vmul.f32 %v200_v37, %v145_v38  ;;  %v155_v42 = vmul.f32 %v200_v37, %v146_v39 }
 0x12d   :  { %v164_v43 = vadd.f32 %v201_v40, %v155_v42  ;;  %v163_v44 = vadd.f32 %v201_v40, %v154_v41 }
 0x12f   :  { %229 = vtanh.f32 %v164_v43 }
 0x130   :  { %231 = vtanh.f32 %v163_v44 }
 0x139   :  { %v230_v45 = vpop.eup %229 }
 0x13a   :  { %v232_v46 = vpop.eup %231  ;;  %v205_v47 = vpack.c.bf16 %v230_v45, %v230_v45 }
 0x13b   :  { %v204_v48 = vpack.c.bf16 %v232_v46, %v232_v46 }
 0x13c   :  { %177 = vst.msk [vmem:[#allocation7 + $0x4] sm:$0xf] %vm175_vm2, %v205_v47 }
 0x13d   :  { %176 = vst.msk [vmem:[#allocation7] sm:$0xf] %vm175_vm2, %v204_v48 }
 0x13e   :  { %288 = shalt.err (!%p285_p6)
}
 0x13f   :  { %s289_s20 = scalar_lea.hbm %s392_s4, 128 }
 0x140   :  { %p290_p7 = scmp.ne.s32.totalorder %s392_s4, %s289_s20  ;;  %p293_p8 = scmp.lt.u32.totalorder %s289_s20, %s392_s4 }
 0x142   :  { %p295_p9 = pnand %p293_p8, %p290_p7 }
 0x144   :  { %298 = shalt.err (!%p295_p9)
}
 0x145   :  { %189 = dma.vmem_to_hbm [thread:$0]  %s184_s18, 128, %s392_s4, [#allocation4], %s306_s25, %s306_s25, %s307_s26  }
 0x146   :  { %303 = dma.done.wait [#allocation4], 128  }
 0x147   :  { %304 = vsyncadd [#allocation4], 4294967168 }
 0x148   :  { %193 = vsyncpa [#allocation3], 1 }
 0x149   :  { %194 = vsyncpa [#allocation6], 1 }
 0x14a   :  { %195 = vsyncpa [#allocation4], 1 }

</bundles_post_ra>
